<compile_context>
chip_gen: v7x
topology: tpu7x:2x2x1
jax: 0.10.0
libtpu: 0.0.40
codegen_flags: <defaults>
</compile_context>

<pallas_src>
import jax
import jax.numpy as jnp
from jax import lax
from jax.experimental import pallas as pl
from jax.experimental.pallas import tpu as pltpu

LANE = 128
SUBLANE = 8


def _round_up(n, m):
    return ((n + m - 1) // m) * m


def rnn_fused_kernel(tok_ref, emb_ref, wih_ref, brnn_ref, whh_ref, wfc_ref, bfc_ref,
                     out_ref):
    """Embedding lookup + hoisted input projection + tanh recurrence + final fc.

    tok_ref : (T*Bp, 1) int32  time-major token ids (batch padded to Bp sublanes)
    emb_ref : (Vtb, Hp) f32    embedding table, rows/lanes zero-padded
    wih_ref : (Hp, Hp)  f32    W_ih^T (zero-padded)
    brnn_ref: (1, Hp)   f32    b_ih + b_hh (zero-padded)
    whh_ref : (Hp, Hp)  bf16   W_hh^T (zero-padded)
    wfc_ref : (Hp, Vp)  bf16   W_fc^T (zero-padded)
    bfc_ref : (1, Vp)   f32    b_fc (zero-padded)
    out_ref : (Bp, Vp)  f32    logits at the last timestep
    """
    TB = tok_ref.shape[0]
    Vtb, Hp = emb_ref.shape
    Bp = out_ref.shape[0]
    T = TB // Bp

    # (1) Input projection hoisted out of the loop AND fused with the embedding:
    #     project the whole table once (one MXU matmul, off the serial chain); a
    #     token's input projection is then just a row pick. Kept f32 for accuracy
    #     (one-off cost, not on the recurrent critical path).
    proj = (
        jnp.dot(emb_ref[...], wih_ref[...], preferred_element_type=jnp.float32)
        + brnn_ref[...]
    )                                                          # (Vtb, Hp) f32

    # (2) In-kernel embedding gather as a one-hot matmul (MXU "gather"; V is tiny).
    #     Exact: each one-hot row selects exactly one f32 row of proj.
    ids = tok_ref[...]                                         # (T*Bp, 1) int32
    cols = lax.broadcasted_iota(jnp.int32, (TB, Vtb), 1)       # (T*Bp, Vtb)
    onehot = jnp.where(cols == ids, 1.0, 0.0).astype(jnp.float32)
    x = jnp.dot(onehot, proj, preferred_element_type=jnp.float32)   # (T*Bp, Hp) f32

    # (3) Recurrence: per step = ONE K=Hp bf16 MXU matmul + f32 add + f32 tanh.
    #     T is static & tiny -> fully unrolled; per-step slices of x are static and
    #     tile-aligned ((8,128) blocks).
    # TODO(synk): for large T switch to lax.fori_loop(..., unroll=4) with X staged in a
    # VMEM scratch so all timesteps are not held live in vregs.
    whh = whh_ref[...]                                         # (Hp, Hp) bf16
    h = jnp.zeros((Bp, Hp), jnp.float32)
    for t in range(T):
        x_t = x[t * Bp:(t + 1) * Bp, :]                        # static, tile-aligned
        h = jnp.tanh(
            x_t + jnp.dot(h.astype(jnp.bfloat16), whh,
                          preferred_element_type=jnp.float32))

    # (4) Last-step fc; lane-dense (Bp, Vp) store.
    out_ref[...] = (
        jnp.dot(h.astype(jnp.bfloat16), wfc_ref[...],
                preferred_element_type=jnp.float32)
        + bfc_ref[...]
    )


def rnn_model_forward(x_tokens, params):
    """Forward pass equivalent to RNNModel.forward (num_layers=1, batch_first)."""
    emb = params["embedding"].astype(jnp.float32)   # (V, H)
    w_ih = params["w_ih"].astype(jnp.float32)       # (H, H)
    w_hh = params["w_hh"].astype(jnp.float32)       # (H, H)
    b_ih = params["b_ih"].astype(jnp.float32)       # (H,)
    b_hh = params["b_hh"].astype(jnp.float32)       # (H,)
    w_fc = params["w_fc"].astype(jnp.float32)       # (V, H)
    b_fc = params["b_fc"].astype(jnp.float32)       # (V,)

    B, T = x_tokens.shape
    V, H = emb.shape
    Hp = _round_up(H, LANE)        # hidden, lane-padded
    Vp = _round_up(V, LANE)        # fc output columns, lane-padded
    Vtb = _round_up(V, LANE)       # embedding-table rows (one-hot contraction dim)
    Bp = _round_up(B, SUBLANE)     # batch, sublane-padded

    # Token ids, time-major, batch padded to Bp. Pad slots reuse id 0: batch rows never
    # interact through any op, and padded output rows are sliced off below.
    ids = jnp.zeros((T, Bp), jnp.int32).at[:, :B].set(x_tokens.T.astype(jnp.int32))
    ids = ids.reshape(T * Bp, 1)

    # Zero padding keeps padded hidden lanes exactly 0 every step (tanh(0)=0) and keeps
    # padded rows/columns from leaking into real logits.
    emb_p = jnp.pad(emb, ((0, Vtb - V), (0, Hp - H)))                       # f32
    wih_t = jnp.pad(w_ih.T, ((0, Hp - H), (0, Hp - H)))                     # f32
    brnn = jnp.pad(b_ih + b_hh, (0, Hp - H)).reshape(1, Hp)                 # f32
    whh_t = jnp.pad(w_hh.T, ((0, Hp - H), (0, Hp - H))).astype(jnp.bfloat16)
    wfc_t = jnp.pad(w_fc.T, ((0, Hp - H), (0, Vp - V))).astype(jnp.bfloat16)
    bfc_p = jnp.pad(b_fc, (0, Vp - V)).reshape(1, Vp)                       # f32

    # Everything is VMEM-resident at these sizes (<1 MiB total), single invocation.
    # TODO(synk): at real scale add a 'parallel' grid over batch (also shards v7x's two
    # TensorCores) and tile the fc over Vp with >=512-wide lane-dense output blocks,
    # setting pltpu.CompilerParams(vmem_limit_bytes=...) for v7x's 64 MiB VMEM.
    vmem = pl.BlockSpec(memory_space=pltpu.MemorySpace.VMEM)
    out_p = pl.pallas_call(
        rnn_fused_kernel,
        out_shape=jax.ShapeDtypeStruct((Bp, Vp), jnp.float32),
        in_specs=[vmem] * 7,
        out_specs=vmem,
    )(ids, emb_p, wih_t, brnn, whh_t, wfc_t, bfc_p)

    return out_p[:B, :V]                                       # strip padding


def reference_forward(x_tokens, params):
    """Pure-JAX f32 reference matching PyTorch nn.RNN semantics."""
    e = jnp.take(params["embedding"], x_tokens, axis=0).astype(jnp.float32)
    B, T, H = e.shape
    h = jnp.zeros((B, H), jnp.float32)
    for t in range(T):
        h = jnp.tanh(e[:, t, :] @ params["w_ih"].T + params["b_ih"]
                     + h @ params["w_hh"].T + params["b_hh"])
    return h @ params["w_fc"].T + params["b_fc"]


if __name__ == "__main__":
    # Small shapes consistent with the module: batch=2, seq=8, hidden=32, vocab=16
    B, T, H, V = 2, 8, 32, 16

    key = jax.random.PRNGKey(0)
    ks = jax.random.split(key, 8)
    params = {
        "embedding": jax.random.normal(ks[0], (V, H), jnp.float32) * 0.1,
        "w_ih":      jax.random.normal(ks[1], (H, H), jnp.float32) * 0.1,
        "w_hh":      jax.random.normal(ks[2], (H, H), jnp.float32) * 0.1,
        "b_ih":      jax.random.normal(ks[3], (H,),   jnp.float32) * 0.1,
        "b_hh":      jax.random.normal(ks[4], (H,),   jnp.float32) * 0.1,
        "w_fc":      jax.random.normal(ks[5], (V, H), jnp.float32) * 0.1,
        "b_fc":      jax.random.normal(ks[6], (V,),   jnp.float32) * 0.1,
    }
    x = jax.random.randint(ks[7], (B, T), 0, V, dtype=jnp.int32)

    out = rnn_model_forward(x, params)
    out = jax.block_until_ready(out)

    ref = reference_forward(x, params)
    assert out.shape == (B, V)
    # Recurrence/fc matmul operands are bf16 (f32 accumulate) -> bf16-level tolerance.
    assert jnp.allclose(out, ref, atol=2e-2, rtol=2e-2), "mismatch vs reference"

    print("KERNEL_OK")
</pallas_src>

<mosaic_0001>
module attributes {stable_mosaic.version = 11 : i64} {
  func.func @rnn_fused_kernel(%arg0: memref<64x1xi32, #tpu.memory_space<vmem>>, %arg1: memref<128x128xf32, #tpu.memory_space<vmem>>, %arg2: memref<128x128xf32, #tpu.memory_space<vmem>>, %arg3: memref<1x128xf32, #tpu.memory_space<vmem>>, %arg4: memref<128x128xbf16, #tpu.memory_space<vmem>>, %arg5: memref<128x128xbf16, #tpu.memory_space<vmem>>, %arg6: memref<1x128xf32, #tpu.memory_space<vmem>>, %arg7: memref<8x128xf32, #tpu.memory_space<vmem>>) attributes {dimension_semantics = [], scalar_prefetch = 0 : i64, scratch_operands = 0 : i64, tpu.core_type = #tpu.core_type<tc>} {
    %c0 = arith.constant 0 : index
    %c0_0 = arith.constant 0 : index
    %0 = vector.load %arg1[%c0, %c0_0] : memref<128x128xf32, #tpu.memory_space<vmem>>, vector<128x128xf32>
    %c0_1 = arith.constant 0 : index
    %c0_2 = arith.constant 0 : index
    %1 = vector.load %arg2[%c0_1, %c0_2] : memref<128x128xf32, #tpu.memory_space<vmem>>, vector<128x128xf32>
    %cst = arith.constant dense<0.000000e+00> : vector<128x128xf32>
    %2 = tpu.matmul %0, %1, %cst {dimension_numbers = #tpu.dot_dimension_numbers<[1], [0], [0], [1], [0, 0, 1, 1], [], []>} : vector<128x128xf32>, vector<128x128xf32>, vector<128x128xf32> -> vector<128x128xf32>
    %c0_3 = arith.constant 0 : index
    %c0_4 = arith.constant 0 : index
    %3 = vector.load %arg3[%c0_3, %c0_4] : memref<1x128xf32, #tpu.memory_space<vmem>>, vector<1x128xf32>
    %4 = vector.broadcast %3 : vector<1x128xf32> to vector<128x128xf32>
    %5 = arith.addf %2, %4 : vector<128x128xf32>
    %c0_5 = arith.constant 0 : index
    %c0_6 = arith.constant 0 : index
    %6 = vector.load %arg0[%c0_5, %c0_6] : memref<64x1xi32, #tpu.memory_space<vmem>>, vector<64x1xi32>
    %7 = tpu.iota {dimensions = array<i32: 1>} : vector<64x128xi32>
    %8 = vector.broadcast %6 : vector<64x1xi32> to vector<64x128xi32>
    %9 = arith.cmpi eq, %7, %8 : vector<64x128xi32>
    %cst_7 = arith.constant 1.000000e+00 : f32
    %cst_8 = arith.constant 0.000000e+00 : f32
    %10 = vector.broadcast %cst_7 : f32 to vector<64x128xf32>
    %11 = vector.broadcast %cst_8 : f32 to vector<64x128xf32>
    %12 = arith.select %9, %10, %11 : vector<64x128xi1>, vector<64x128xf32>
    %cst_9 = arith.constant dense<0.000000e+00> : vector<64x128xf32>
    %13 = tpu.matmul %12, %5, %cst_9 {dimension_numbers = #tpu.dot_dimension_numbers<[1], [0], [0], [1], [0, 0, 1, 1], [], []>} : vector<64x128xf32>, vector<128x128xf32>, vector<64x128xf32> -> vector<64x128xf32>
    %c0_10 = arith.constant 0 : index
    %c0_11 = arith.constant 0 : index
    %14 = vector.load %arg4[%c0_10, %c0_11] : memref<128x128xbf16, #tpu.memory_space<vmem>>, vector<128x128xbf16>
    %cst_12 = arith.constant 0.000000e+00 : f32
    %15 = vector.broadcast %cst_12 : f32 to vector<8x128xf32>
    %16 = vector.extract_strided_slice %13 {offsets = [0, 0], sizes = [8, 128], strides = [1, 1]} : vector<64x128xf32> to vector<8x128xf32>
    %17 = arith.truncf %15 : vector<8x128xf32> to vector<8x128xbf16>
    %cst_13 = arith.constant dense<0.000000e+00> : vector<8x128xf32>
    %18 = tpu.matmul %17, %14, %cst_13 {dimension_numbers = #tpu.dot_dimension_numbers<[1], [0], [0], [1], [0, 0, 1, 1], [], []>} : vector<8x128xbf16>, vector<128x128xbf16>, vector<8x128xf32> -> vector<8x128xf32>
    %19 = arith.addf %16, %18 : vector<8x128xf32>
    %20 = math.tanh %19 : vector<8x128xf32>
    %21 = vector.extract_strided_slice %13 {offsets = [8, 0], sizes = [8, 128], strides = [1, 1]} : vector<64x128xf32> to vector<8x128xf32>
    %22 = arith.truncf %20 : vector<8x128xf32> to vector<8x128xbf16>
    %cst_14 = arith.constant dense<0.000000e+00> : vector<8x128xf32>
    %23 = tpu.matmul %22, %14, %cst_14 {dimension_numbers = #tpu.dot_dimension_numbers<[1], [0], [0], [1], [0, 0, 1, 1], [], []>} : vector<8x128xbf16>, vector<128x128xbf16>, vector<8x128xf32> -> vector<8x128xf32>
    %24 = arith.addf %21, %23 : vector<8x128xf32>
    %25 = math.tanh %24 : vector<8x128xf32>
    %26 = vector.extract_strided_slice %13 {offsets = [16, 0], sizes = [8, 128], strides = [1, 1]} : vector<64x128xf32> to vector<8x128xf32>
    %27 = arith.truncf %25 : vector<8x128xf32> to vector<8x128xbf16>
    %cst_15 = arith.constant dense<0.000000e+00> : vector<8x128xf32>
    %28 = tpu.matmul %27, %14, %cst_15 {dimension_numbers = #tpu.dot_dimension_numbers<[1], [0], [0], [1], [0, 0, 1, 1], [], []>} : vector<8x128xbf16>, vector<128x128xbf16>, vector<8x128xf32> -> vector<8x128xf32>
    %29 = arith.addf %26, %28 : vector<8x128xf32>
    %30 = math.tanh %29 : vector<8x128xf32>
    %31 = vector.extract_strided_slice %13 {offsets = [24, 0], sizes = [8, 128], strides = [1, 1]} : vector<64x128xf32> to vector<8x128xf32>
    %32 = arith.truncf %30 : vector<8x128xf32> to vector<8x128xbf16>
    %cst_16 = arith.constant dense<0.000000e+00> : vector<8x128xf32>
    %33 = tpu.matmul %32, %14, %cst_16 {dimension_numbers = #tpu.dot_dimension_numbers<[1], [0], [0], [1], [0, 0, 1, 1], [], []>} : vector<8x128xbf16>, vector<128x128xbf16>, vector<8x128xf32> -> vector<8x128xf32>
    %34 = arith.addf %31, %33 : vector<8x128xf32>
    %35 = math.tanh %34 : vector<8x128xf32>
    %36 = vector.extract_strided_slice %13 {offsets = [32, 0], sizes = [8, 128], strides = [1, 1]} : vector<64x128xf32> to vector<8x128xf32>
    %37 = arith.truncf %35 : vector<8x128xf32> to vector<8x128xbf16>
    %cst_17 = arith.constant dense<0.000000e+00> : vector<8x128xf32>
    %38 = tpu.matmul %37, %14, %cst_17 {dimension_numbers = #tpu.dot_dimension_numbers<[1], [0], [0], [1], [0, 0, 1, 1], [], []>} : vector<8x128xbf16>, vector<128x128xbf16>, vector<8x128xf32> -> vector<8x128xf32>
    %39 = arith.addf %36, %38 : vector<8x128xf32>
    %40 = math.tanh %39 : vector<8x128xf32>
    %41 = vector.extract_strided_slice %13 {offsets = [40, 0], sizes = [8, 128], strides = [1, 1]} : vector<64x128xf32> to vector<8x128xf32>
    %42 = arith.truncf %40 : vector<8x128xf32> to vector<8x128xbf16>
    %cst_18 = arith.constant dense<0.000000e+00> : vector<8x128xf32>
    %43 = tpu.matmul %42, %14, %cst_18 {dimension_numbers = #tpu.dot_dimension_numbers<[1], [0], [0], [1], [0, 0, 1, 1], [], []>} : vector<8x128xbf16>, vector<128x128xbf16>, vector<8x128xf32> -> vector<8x128xf32>
    %44 = arith.addf %41, %43 : vector<8x128xf32>
    %45 = math.tanh %44 : vector<8x128xf32>
    %46 = vector.extract_strided_slice %13 {offsets = [48, 0], sizes = [8, 128], strides = [1, 1]} : vector<64x128xf32> to vector<8x128xf32>
    %47 = arith.truncf %45 : vector<8x128xf32> to vector<8x128xbf16>
    %cst_19 = arith.constant dense<0.000000e+00> : vector<8x128xf32>
    %48 = tpu.matmul %47, %14, %cst_19 {dimension_numbers = #tpu.dot_dimension_numbers<[1], [0], [0], [1], [0, 0, 1, 1], [], []>} : vector<8x128xbf16>, vector<128x128xbf16>, vector<8x128xf32> -> vector<8x128xf32>
    %49 = arith.addf %46, %48 : vector<8x128xf32>
    %50 = math.tanh %49 : vector<8x128xf32>
    %51 = vector.extract_strided_slice %13 {offsets = [56, 0], sizes = [8, 128], strides = [1, 1]} : vector<64x128xf32> to vector<8x128xf32>
    %52 = arith.truncf %50 : vector<8x128xf32> to vector<8x128xbf16>
    %cst_20 = arith.constant dense<0.000000e+00> : vector<8x128xf32>
    %53 = tpu.matmul %52, %14, %cst_20 {dimension_numbers = #tpu.dot_dimension_numbers<[1], [0], [0], [1], [0, 0, 1, 1], [], []>} : vector<8x128xbf16>, vector<128x128xbf16>, vector<8x128xf32> -> vector<8x128xf32>
    %54 = arith.addf %51, %53 : vector<8x128xf32>
    %55 = math.tanh %54 : vector<8x128xf32>
    %56 = arith.truncf %55 : vector<8x128xf32> to vector<8x128xbf16>
    %c0_21 = arith.constant 0 : index
    %c0_22 = arith.constant 0 : index
    %57 = vector.load %arg5[%c0_21, %c0_22] : memref<128x128xbf16, #tpu.memory_space<vmem>>, vector<128x128xbf16>
    %cst_23 = arith.constant dense<0.000000e+00> : vector<8x128xf32>
    %58 = tpu.matmul %56, %57, %cst_23 {dimension_numbers = #tpu.dot_dimension_numbers<[1], [0], [0], [1], [0, 0, 1, 1], [], []>} : vector<8x128xbf16>, vector<128x128xbf16>, vector<8x128xf32> -> vector<8x128xf32>
    %c0_24 = arith.constant 0 : index
    %c0_25 = arith.constant 0 : index
    %59 = vector.load %arg6[%c0_24, %c0_25] : memref<1x128xf32, #tpu.memory_space<vmem>>, vector<1x128xf32>
    %60 = vector.broadcast %59 : vector<1x128xf32> to vector<8x128xf32>
    %61 = arith.addf %58, %60 : vector<8x128xf32>
    %c0_26 = arith.constant 0 : index
    %c0_27 = arith.constant 0 : index
    %62 = vector.load %arg7[%c0_26, %c0_27] : memref<8x128xf32, #tpu.memory_space<vmem>>, vector<8x128xf32>
    tpu.vector_store %arg7[%c0_26, %c0_27], %61 {strides = array<i32>} : memref<8x128xf32, #tpu.memory_space<vmem>>, vector<8x128xf32>,
    return
  }
}

</mosaic_0001>

<bundles_post_ra>
// kernel: tpu_custom_call.1
= control target key start
LH: loop header
LB: loop body
LE: loop exit
PB: predicated region body
PF: predicated region fallthrough
CT: control target
= control target key end

     0   :  { %12 = vsyncpa [#allocation3], 0  ;;  %s1958_s0 = inlined_call_operand.vmem [shape: s32[64,1], index: 0, kind: input, shape index: {}]   ;;  %s1959_s1 = inlined_call_operand.hbm [shape: f32[128,128], index: 1, kind: input, shape index: {}]   ;;  %s1960_s2 = inlined_call_operand.hbm [shape: f32[128,128], index: 2, kind: input, shape index: {}]   ;;  %s1961_s3 = inlined_call_operand.vmem [shape: f32[1,128], index: 3, kind: input, shape index: {}]   ;;  %s1962_s4 = inlined_call_operand.vmem [shape: bf16[128,128], index: 4, kind: input, shape index: {}]   ;;  %s1963_s5 = inlined_call_operand.hbm [shape: bf16[128,128], index: 5, kind: input, shape index: {}]   ;;  %s1964_s6 = inlined_call_operand.vmem [shape: f32[1,128], index: 6, kind: input, shape index: {}]   ;;  %s1965_s7 = inlined_call_operand.hbm [shape: f32[8,128], index: 7, kind: output, shape index: {}]  }
   0x1   :  { %13 = vsyncpa [#allocation6], 0 }
   0x2   :  { %14 = vsyncpa [#allocation4], 0  ;;  %s1591_s24 = smov [#allocation5]   ;;  %s1592_s26 = smov [#allocation2]  }
   0x3   :  { %s34_s25 = sshll.u32 %s1591_s24, 4  ;;  %s22_s27 = sshll.u32 %s1592_s26, 4  ;;  %s35_s25 = int_to_ptr.vmem [resolvable:$true] %s34_s25  ;;  %s1643_s27 = int_to_ptr.vmem [resolvable:$true] %s22_s27 }
   0x4   :  { %s1497_s30 = scalar_lea.hbm %s1960_s2, 2048 }
   0x5   :  { %p1498_p0 = scmp.ne.s32.totalorder %s1960_s2, %s1497_s30  ;;  %p1501_p1 = scmp.lt.u32.totalorder %s1497_s30, %s1960_s2 }
   0x7   :  { %p1503_p2 = pnand %p1501_p1, %p1498_p0 }
   0x9   :  { %1506 = shalt.err (!%p1503_p2)
}
   0xa   :  { %s1507_s12 = scalar_lea.vmem %s35_s25, 2048  ;;  %p1512_p4 = scmp.lt.s32.totalorder %s35_s25, %s35_s25 }
   0xb   :  { %p1508_p3 = scmp.ne.s32.totalorder %s35_s25, %s1507_s12  ;;  %p1513_p5 = scmp.lt.s32.totalorder %s1507_s12, %s1507_s12 }
   0xd   :  { %p1514_p6 = por %p1513_p5, %p1512_p4 }
   0xf   :  { %p1515_p7 = pnand %p1514_p6, %p1508_p3 }
  0x11   :  { %1518 = shalt.err (!%p1515_p7)
}
  0x12   :  { %s1593_s13 = smov 128   ;;  %s1594_s14 = smov 8  }
  0x13   :  { %40 = dma.hbm_to_vmem [thread:$0]  %s1960_s2, 2048, %s35_s25, [#allocation6], %s1593_s13, %s1593_s13, %s1594_s14  }
  0x14   :  { %s1519_s19 = scalar_lea.hbm %s1959_s1, 2048 }
  0x15   :  { %p1520_p8 = scmp.ne.s32.totalorder %s1959_s1, %s1519_s19  ;;  %p1523_p9 = scmp.lt.u32.totalorder %s1519_s19, %s1959_s1 }
  0x17   :  { %p1525_p10 = pnand %p1523_p9, %p1520_p8 }
  0x19   :  { %1528 = shalt.err (!%p1525_p10)
}
  0x1a   :  { %s1529_s24 = scalar_lea.vmem %s1643_s27, 2048  ;;  %p1534_p12 = scmp.lt.s32.totalorder %s1643_s27, %s1643_s27 }
  0x1b   :  { %p1530_p11 = scmp.ne.s32.totalorder %s1643_s27, %s1529_s24  ;;  %p1535_p13 = scmp.lt.s32.totalorder %s1529_s24, %s1529_s24 }
  0x1d   :  { %p1536_p0 = por %p1535_p13, %p1534_p12 }
  0x1f   :  { %p1537_p1 = pnand %p1536_p0, %p1530_p11 }
  0x21   :  { %1540 = shalt.err (!%p1537_p1)
}
  0x22   :  { %28 = dma.hbm_to_vmem [thread:$0]  %s1959_s1, 2048, %s1643_s27, [#allocation3], %s1593_s13, %s1593_s13, %s1594_s14  }
  0x23   :  { %s1595_s26 = smov [#allocation7]   ;;  %s1541_s8 = scalar_lea.hbm %s1963_s5, 1024 }
  0x24   :  { %s50_s28 = sshll.u32 %s1595_s26, 4  ;;  %p1542_p2 = scmp.ne.s32.totalorder %s1963_s5, %s1541_s8  ;;  %s51_s28 = int_to_ptr.vmem [resolvable:$true] %s50_s28 }
  0x25   :  { %p1545_p3 = scmp.lt.u32.totalorder %s1541_s8, %s1963_s5 }
  0x27   :  { %p1547_p4 = pnand %p1545_p3, %p1542_p2 }
  0x29   :  { %1550 = shalt.err (!%p1547_p4)
}
  0x2a   :  { %s1551_s15 = scalar_lea.vmem %s51_s28, 1024  ;;  %p1556_p6 = scmp.lt.s32.totalorder %s51_s28, %s51_s28 }
  0x2b   :  { %p1552_p5 = scmp.ne.s32.totalorder %s51_s28, %s1551_s15  ;;  %p1557_p7 = scmp.lt.s32.totalorder %s1551_s15, %s1551_s15 }
  0x2d   :  { %p1558_p8 = por %p1557_p7, %p1556_p6 }
  0x2f   :  { %p1559_p9 = pnand %p1558_p8, %p1552_p5 }
  0x31   :  { %1562 = shalt.err (!%p1559_p9)
}
  0x32   :  { %s1596_s1 = smov 64   ;;  %s1597_s27 = smov 4  }
  0x33   :  { %56 = dma.hbm_to_vmem [thread:$0]  %s1963_s5, 1024, %s51_s28, [#allocation6], %s1596_s1, %s1596_s1, %s1597_s27  }
  0x34   :  { %1585 = dma.done.wait [#allocation3], 2048  }
  0x35   :  { %1586 = vsyncadd [#allocation3], 4294965248 }
  0x36   :  { %1587 = dma.done.wait [#allocation6], 3072  }
  0x37   :  { %1588 = vsyncadd [#allocation6], 4294964224  ;;  %v1598_v0 = vmov 0   ;;  %v85_v1 = vld [vmem:[#allocation5] sm:$0xff]  ;;  %v86_v2 = vld [vmem:[#allocation5 + $0x8] sm:$0xff]  ;;  %v1599_v49 = vmov 0.0   ;;  %v261_v55 = vlaneseq }
  0x38   :  { %1463 = vset.pattern.permute.xlu0 %v1598_v0  ;;  %1464 = vset.pattern.permute.xlu1 %v1598_v0  ;;  %v87_v3 = vld [vmem:[#allocation5 + $0x10] sm:$0xff]  ;;  %v1387_v4 = vpack.c.bf16 %v86_v2, %v85_v1  ;;  %v88_v5 = vld [vmem:[#allocation5 + $0x18] sm:$0xff]  ;;  %v89_v7 = vld [vmem:[#allocation5 + $0x20] sm:$0xff]  ;;  %v1600_v60 = vmov 1.0   ;;  %vm1601_vm1 = vmmov 0   ;;  %s1602_s22 = smov [#allocation8]  }
  0x39   :  { %v1391_v6 = vpack.c.bf16 %v88_v5, %v87_v3  ;;  %v90_v8 = vld [vmem:[#allocation5 + $0x28] sm:$0xff]  ;;  %v69_v10 = vld [vmem:[#allocation2] sm:$0xff]  ;;  %v91_v11 = vld [vmem:[#allocation5 + $0x30] sm:$0xff]  ;;  %v1757_v57 = vand.u32 127, %v261_v55  ;;  %s934_s23 = sshll.u32 %s1602_s22, 4  ;;  %s935_s23 = int_to_ptr.vmem [resolvable:$true] %s934_s23 }
  0x3a   :  { %1388 = vmatprep.subr.bf16.mxu0 %v1387_v4  ;;  %v1395_v9 = vpack.c.bf16 %v90_v8, %v89_v7  ;;  %v92_v12 = vld [vmem:[#allocation5 + $0x38] sm:$0xff]  ;;  %1139 = vmatprep.mubr.f32.mxu0 %v69_v10  ;;  %v93_v14 = vld [vmem:[#allocation5 + $0x40] sm:$0xff]  ;;  %v94_v15 = vld [vmem:[#allocation5 + $0x48] sm:$0xff]  ;;  %s1563_s24 = scalar_lea.vmem %s935_s23, 128  ;;  %p1568_p11 = scmp.lt.s32.totalorder %s935_s23, %s935_s23 }
  0x3b   :  { %1390 = vmatpush3.bf16.msra.mxu0 %v1387_v4  ;;  %v1399_v13 = vpack.c.bf16 %v92_v12, %v91_v11  ;;  %v253_v16 = vld [vmem:[%s1958_s0] sm:$0xff]  ;;  %v95_v17 = vld [vmem:[#allocation5 + $0x50] sm:$0xff]  ;;  %v96_v18 = vld [vmem:[#allocation5 + $0x58] sm:$0xff]  ;;  %v1403_v22 = vpack.c.bf16 %v94_v15, %v93_v14  ;;  %p1564_p10 = scmp.ne.s32.totalorder %s935_s23, %s1563_s24  ;;  %p1569_p12 = scmp.lt.s32.totalorder %s1563_s24, %s1563_s24 }
  0x3c   :  { %1392 = vmatprep.subr.bf16.mxu0 %v1391_v6  ;;  %264 = vperm.xlu0 %1463, %v253_v16   ;;  %v254_v19 = vld [vmem:[%s1958_s0 + $0x8] sm:$0xff]  ;;  %v255_v20 = vld [vmem:[%s1958_s0 + $0x10] sm:$0xff]  ;;  %v256_v21 = vld [vmem:[%s1958_s0 + $0x18] sm:$0xff]  ;;  %v1407_v27 = vpack.c.bf16 %v96_v18, %v95_v17 }
  0x3d   :  { %270 = vperm.xlu1 %1464, %v255_v20   ;;  %v257_v23 = vld [vmem:[%s1958_s0 + $0x20] sm:$0xff]  ;;  %v98_v25 = vld [vmem:[#allocation5 + $0x68] sm:$0xff]  ;;  %v259_v28 = vld [vmem:[%s1958_s0 + $0x30] sm:$0xff]  ;;  %p1570_p13 = por %p1569_p12, %p1568_p11 }
  0x3e   :  { %v97_v24 = vld [vmem:[#allocation5 + $0x60] sm:$0xff]  ;;  %v258_v26 = vld [vmem:[%s1958_s0 + $0x28] sm:$0xff]  ;;  %v99_v29 = vld [vmem:[#allocation5 + $0x70] sm:$0xff] }
  0x3f   :  { %1394 = vmatpush3.bf16.msra.mxu0 %v1391_v6  ;;  %v100_v30 = vld [vmem:[#allocation5 + $0x78] sm:$0xff]  ;;  %v1411_v31 = vpack.c.bf16 %v98_v25, %v97_v24  ;;  %v70_v33 = vld [vmem:[#allocation2 + $0x8] sm:$0xff]  ;;  %v71_v34 = vld [vmem:[#allocation2 + $0x10] sm:$0xff]  ;;  %p1571_p0 = pnand %p1570_p13, %p1564_p10 }
  0x40   :  { %1396 = vmatprep.subr.bf16.mxu0 %v1395_v9  ;;  %267 = vperm.xlu0 %1463, %v254_v19   ;;  %v1415_v32 = vpack.c.bf16 %v100_v30, %v99_v29  ;;  %v72_v35 = vld [vmem:[#allocation2 + $0x18] sm:$0xff]  ;;  %v73_v36 = vld [vmem:[#allocation2 + $0x20] sm:$0xff]  ;;  %v74_v37 = vld [vmem:[#allocation2 + $0x28] sm:$0xff] }
  0x41   :  { %273 = vperm.xlu1 %1464, %v256_v21   ;;  %v75_v38 = vld [vmem:[#allocation2 + $0x30] sm:$0xff]  ;;  %v76_v39 = vld [vmem:[#allocation2 + $0x38] sm:$0xff]  ;;  %v77_v40 = vld [vmem:[#allocation2 + $0x40] sm:$0xff] }
  0x42   :  { %v78_v41 = vld [vmem:[#allocation2 + $0x48] sm:$0xff]  ;;  %v79_v42 = vld [vmem:[#allocation2 + $0x50] sm:$0xff]  ;;  %v80_v43 = vld [vmem:[#allocation2 + $0x58] sm:$0xff] }
  0x43   :  { %1398 = vmatpush3.bf16.msra.mxu0 %v1395_v9  ;;  %v81_v44 = vld [vmem:[#allocation2 + $0x60] sm:$0xff]  ;;  %v82_v45 = vld [vmem:[#allocation2 + $0x68] sm:$0xff]  ;;  %v83_v46 = vld [vmem:[#allocation2 + $0x70] sm:$0xff] }
  0x44   :  { %1400 = vmatprep.subr.bf16.mxu0 %v1399_v13  ;;  %276 = vperm.xlu0 %1463, %v257_v23   ;;  %v84_v47 = vld [vmem:[#allocation2 + $0x78] sm:$0xff]  ;;  %v1712_v48 = vld [vmem:[%s1962_s4] sm:$0xff]   ;;  %v1720_v50 = vld [vmem:[%s1962_s4 + $0x8] sm:$0xff]  }
  0x45   :  { %279 = vperm.xlu1 %1464, %v258_v26   ;;  %v1727_v51 = vld [vmem:[%s1962_s4 + $0x10] sm:$0xff]   ;;  %v1734_v52 = vld [vmem:[%s1962_s4 + $0x18] sm:$0xff]   ;;  %v1741_v53 = vld [vmem:[%s1962_s4 + $0x20] sm:$0xff]  }
  0x46   :  { %v1748_v54 = vld [vmem:[%s1962_s4 + $0x28] sm:$0xff]   ;;  %v1755_v56 = vld [vmem:[%s1962_s4 + $0x30] sm:$0xff]   ;;  %v1764_v58 = vld [vmem:[%s1962_s4 + $0x38] sm:$0xff]  }
  0x47   :  { %1402 = vmatpush3.bf16.msra.mxu0 %v1399_v13  ;;  %v260_v61 = vld [vmem:[%s1958_s0 + $0x38] sm:$0xff]  ;;  %v944_v62 = vld [vmem:[%s1961_s3] ss:$0 sm:$0xff] }
  0x48   :  { %1404 = vmatprep.subr.bf16.mxu0 %v1403_v22  ;;  %282 = vperm.xlu0 %1463, %v259_v28  }
  0x49   :  { %285 = vperm.xlu1 %1464, %v260_v61  }
  0x4b   :  { %1406 = vmatpush3.bf16.msra.mxu0 %v1403_v22 }
  0x4c   :  { %1408 = vmatprep.subr.bf16.mxu0 %v1407_v27 }
  0x4f   :  { %1410 = vmatpush3.bf16.msra.mxu0 %v1407_v27 }
  0x50   :  { %1412 = vmatprep.subr.bf16.mxu0 %v1411_v31 }
  0x53   :  { %1414 = vmatpush3.bf16.msra.mxu0 %v1411_v31 }
  0x54   :  { %1416 = vmatprep.subr.bf16.mxu0 %v1415_v32 }
  0x57   :  { %1418 = vmatpush3.bf16.msra.mxu0 %v1415_v32 }
  0x58   :  { %1207 = vmatprep.subr.bf16.mxu0 %v1599_v49 }
  0x5a   :  { %1140 = vmatmul.mubr.f32.vlgmr.msra.gmra.mrb[0].mxu0 %v70_v33 }
  0x5b   :  { %1142 = vmatprep.mubr.f32.mxu0 %v71_v34  ;;  %1208 = vmatpush3.bf16.msra.mxu0 %v1712_v48 }
  0x5c   :  { %1209 = vmatprep.subr.bf16.mxu0 %v1599_v49 }
  0x5e   :  { %1143 = vmatmul.mubr.f32.gmra.mrb[2].mxu0 %v72_v35 }
  0x5f   :  { %1145 = vmatprep.mubr.f32.mxu0 %v73_v36  ;;  %1210 = vmatpush3.bf16.msra.mxu0 %v1720_v50 }
  0x60   :  { %1211 = vmatprep.subr.bf16.mxu0 %v1599_v49 }
  0x62   :  { %1146 = vmatmul.mubr.f32.gmra.mrb[4].mxu0 %v74_v37 }
  0x63   :  { %1148 = vmatprep.mubr.f32.mxu0 %v75_v38  ;;  %1212 = vmatpush3.bf16.msra.mxu0 %v1727_v51 }
  0x64   :  { %1213 = vmatprep.subr.bf16.mxu0 %v1599_v49 }
  0x66   :  { %1149 = vmatmul.mubr.f32.gmra.mrb[6].mxu0 %v76_v39 }
  0x67   :  { %1151 = vmatprep.mubr.f32.mxu0 %v77_v40  ;;  %1214 = vmatpush3.bf16.msra.mxu0 %v1734_v52 }
  0x68   :  { %1215 = vmatprep.subr.bf16.mxu0 %v1599_v49 }
  0x6a   :  { %1152 = vmatmul.mubr.f32.gmra.mrb[8].mxu0 %v78_v41 }
  0x6b   :  { %1154 = vmatprep.mubr.f32.mxu0 %v79_v42  ;;  %1216 = vmatpush3.bf16.msra.mxu0 %v1741_v53 }
  0x6c   :  { %1217 = vmatprep.subr.bf16.mxu0 %v1599_v49 }
  0x6e   :  { %1155 = vmatmul.mubr.f32.gmra.mrb[10].mxu0 %v80_v43 }
  0x6f   :  { %1157 = vmatprep.mubr.f32.mxu0 %v81_v44  ;;  %1218 = vmatpush3.bf16.msra.mxu0 %v1748_v54 }
  0x70   :  { %1219 = vmatprep.subr.bf16.mxu0 %v1599_v49 }
  0x72   :  { %1158 = vmatmul.mubr.f32.gmra.mrb[12].mxu0 %v82_v45 }
  0x73   :  { %1160 = vmatprep.mubr.f32.mxu0 %v83_v46  ;;  %1220 = vmatpush3.bf16.msra.mxu0 %v1755_v56 }
  0x74   :  { %1221 = vmatprep.subr.bf16.mxu0 %v1599_v49 }
  0x76   :  { %1161 = vmatmul.mubr.f32.gmra.mrb[14].mxu0 %v84_v47 }
  0x77   :  { %1222 = vmatpush3.bf16.msra.mxu0 %v1764_v58  ;;  %1223 = vmatprep.mubr.msk.bf16.mxu0 %vm1601_vm1, %v1599_v49 }
  0x78   :  { %1247 = vmatprep.subr.bf16.mxu0 %v1599_v49 }
  0x7a   :  { %1224 = vmatmul.mubr.bf16.vlgmr.msra.gmra.mrb[16].mxu0 %v1598_v0 }
  0x7b   :  { %1248 = vmatpush3.bf16.msra.mxu0 %v1712_v48  ;;  %1263 = vmatprep.mubr.msk.bf16.mxu0 %vm1601_vm1, %v1599_v49 }
  0x7c   :  { %1249 = vmatprep.subr.bf16.mxu0 %v1599_v49 }
  0x7f   :  { %1250 = vmatpush3.bf16.msra.mxu0 %v1720_v50 }
  0x80   :  { %1251 = vmatprep.subr.bf16.mxu0 %v1599_v49 }
  0x83   :  { %1252 = vmatpush3.bf16.msra.mxu0 %v1727_v51 }
  0x84   :  { %1253 = vmatprep.subr.bf16.mxu0 %v1599_v49 }
  0x87   :  { %1254 = vmatpush3.bf16.msra.mxu0 %v1734_v52 }
  0x88   :  { %1255 = vmatprep.subr.bf16.mxu0 %v1599_v49 }
  0x8b   :  { %1256 = vmatpush3.bf16.msra.mxu0 %v1741_v53 }
  0x8c   :  { %1257 = vmatprep.subr.bf16.mxu0 %v1599_v49 }
  0x8f   :  { %1258 = vmatpush3.bf16.msra.mxu0 %v1748_v54 }
  0x90   :  { %1259 = vmatprep.subr.bf16.mxu0 %v1599_v49 }
  0x93   :  { %1260 = vmatpush3.bf16.msra.mxu0 %v1755_v56 }
  0x94   :  { %1261 = vmatprep.subr.bf16.mxu0 %v1599_v49 }
  0x97   :  { %1262 = vmatpush3.bf16.msra.mxu0 %v1764_v58 }
  0x98   :  { %1287 = vmatprep.subr.bf16.mxu0 %v1599_v49 }
  0xbb   :  { %v265_v59 = vpop.permute.xlu0 %264 }
  0xbc   :  { %vm287_vm0 = vcmp.eq.s32.totalorder %v1757_v57, %v265_v59  ;;  %v271_v35 = vpop.permute.xlu1 %270 }
  0xbd   :  { %1195 = vmatprep.mubr.msk.f32.mxu1 %vm287_vm0, %v1600_v60  ;;  %vm289_vm2 = vcmp.eq.s32.totalorder %v1757_v57, %v271_v35 }
  0xbf   :  { %v268_v39 = vpop.permute.xlu0 %267 }
  0xc0   :  { %v274_v41 = vpop.permute.xlu1 %273  ;;  %vm288_vm3 = vcmp.eq.s32.totalorder %v1757_v57, %v268_v39 }
  0xc1   :  { %vm290_vm4 = vcmp.eq.s32.totalorder %v1757_v57, %v274_v41 }
  0xc3   :  { %v277_v42 = vpop.permute.xlu0 %276 }
  0xc4   :  { %v280_v43 = vpop.permute.xlu1 %279  ;;  %vm291_vm5 = vcmp.eq.s32.totalorder %v1757_v57, %v277_v42 }
  0xc5   :  { %vm292_vm6 = vcmp.eq.s32.totalorder %v1757_v57, %v280_v43 }
  0xc7   :  { %v283_v44 = vpop.permute.xlu0 %282 }
  0xc8   :  { %vm293_vm7 = vcmp.eq.s32.totalorder %v1757_v57, %v283_v44  ;;  %v286_v45 = vpop.permute.xlu1 %285  ;;  %v1477_v44 = vld [vmem:[#allocation7 + $0x20] sm:$0xff]  }
  0xc9   :  { %vm294_vm8 = vcmp.eq.s32.totalorder %v1757_v57, %v286_v45  ;;  %v1478_v45 = vld [vmem:[#allocation7 + $0x28] sm:$0xff]  }
 0x12d   :  { %v1141_v63 = vpop.f32.mrb[0].mxu0 }
 0x12e   :  { %v180_v0 = vadd.f32 %v1141_v63, %v944_v62  ;;  %v174_v1 = vpop.f32.mrb[1].mxu0 }
 0x12f   :  { %v175_v2 = vadd.f32 %v944_v62, %v174_v1 }
 0x131   :  { %v1144_v3 = vpop.f32.mrb[2].mxu0  ;;  %v1419_v4 = vpack.c.bf16 %v180_v0, %v175_v2 }
 0x132   :  { %v190_v5 = vadd.f32 %v1144_v3, %v944_v62  ;;  %v184_v6 = vpop.f32.mrb[3].mxu0 }
 0x133   :  { %v185_v7 = vadd.f32 %v944_v62, %v184_v6  ;;  %1420 = vmatprep.subr.bf16.mxu1 %v1419_v4 }
 0x134   :  { %1422 = vmatpush3.bf16.msra.mxu1 %v1419_v4 }
 0x135   :  { %v1423_v8 = vpack.c.bf16 %v190_v5, %v185_v7  ;;  %v1147_v9 = vpop.f32.mrb[4].mxu0 }
 0x136   :  { %v200_v10 = vadd.f32 %v1147_v9, %v944_v62  ;;  %v194_v11 = vpop.f32.mrb[5].mxu0 }
 0x137   :  { %v195_v12 = vadd.f32 %v944_v62, %v194_v11  ;;  %1424 = vmatprep.subr.bf16.mxu1 %v1423_v8 }
 0x138   :  { %1426 = vmatpush3.bf16.msra.mxu1 %v1423_v8 }
 0x139   :  { %v1427_v13 = vpack.c.bf16 %v200_v10, %v195_v12  ;;  %v1150_v14 = vpop.f32.mrb[6].mxu0 }
 0x13a   :  { %v210_v15 = vadd.f32 %v1150_v14, %v944_v62  ;;  %v204_v16 = vpop.f32.mrb[7].mxu0 }
 0x13b   :  { %v205_v17 = vadd.f32 %v944_v62, %v204_v16  ;;  %1428 = vmatprep.subr.bf16.mxu1 %v1427_v13 }
 0x13c   :  { %1430 = vmatpush3.bf16.msra.mxu1 %v1427_v13 }
 0x13d   :  { %v1431_v18 = vpack.c.bf16 %v210_v15, %v205_v17  ;;  %v1153_v19 = vpop.f32.mrb[8].mxu0 }
 0x13e   :  { %v220_v20 = vadd.f32 %v1153_v19, %v944_v62  ;;  %v214_v21 = vpop.f32.mrb[9].mxu0 }
 0x13f   :  { %v215_v22 = vadd.f32 %v944_v62, %v214_v21  ;;  %1432 = vmatprep.subr.bf16.mxu1 %v1431_v18 }
 0x140   :  { %1434 = vmatpush3.bf16.msra.mxu1 %v1431_v18 }
 0x141   :  { %v1435_v23 = vpack.c.bf16 %v220_v20, %v215_v22  ;;  %v1156_v24 = vpop.f32.mrb[10].mxu0 }
 0x142   :  { %v230_v25 = vadd.f32 %v1156_v24, %v944_v62  ;;  %v224_v26 = vpop.f32.mrb[11].mxu0 }
 0x143   :  { %v225_v27 = vadd.f32 %v944_v62, %v224_v26  ;;  %1436 = vmatprep.subr.bf16.mxu1 %v1435_v23 }
 0x144   :  { %1438 = vmatpush3.bf16.msra.mxu1 %v1435_v23 }
 0x145   :  { %v1439_v28 = vpack.c.bf16 %v230_v25, %v225_v27  ;;  %v1159_v29 = vpop.f32.mrb[12].mxu0 }
 0x146   :  { %v240_v30 = vadd.f32 %v1159_v29, %v944_v62  ;;  %v234_v31 = vpop.f32.mrb[13].mxu0 }
 0x147   :  { %v235_v32 = vadd.f32 %v944_v62, %v234_v31  ;;  %1440 = vmatprep.subr.bf16.mxu1 %v1439_v28 }
 0x148   :  { %1442 = vmatpush3.bf16.msra.mxu1 %v1439_v28 }
 0x149   :  { %v1443_v33 = vpack.c.bf16 %v240_v30, %v235_v32  ;;  %v1162_v34 = vpop.f32.mrb[14].mxu0 }
 0x14a   :  { %v250_v36 = vadd.f32 %v1162_v34, %v944_v62  ;;  %v244_v37 = vpop.f32.mrb[15].mxu0 }
 0x14b   :  { %v245_v38 = vadd.f32 %v944_v62, %v244_v37  ;;  %1444 = vmatprep.subr.bf16.mxu1 %v1443_v33 }
 0x14c   :  { %1446 = vmatpush3.bf16.msra.mxu1 %v1443_v33 }
 0x14d   :  { %v1447_v40 = vpack.c.bf16 %v250_v36, %v245_v38  ;;  %v506_v46 = vpop.f32.mrb[16].mxu0  ;;  %v1476_v36 = vld [vmem:[#allocation7 + $0x18] sm:$0xff]  }
 0x14e   :  { %v1225_v47 = vpop.f32.mrb[17].mxu0 }
 0x14f   :  { %1448 = vmatprep.subr.bf16.mxu1 %v1447_v40  ;;  %v509_v55 = vpop.f32.mrb[18].mxu0  ;;  %v1480_v47 = vld [vmem:[#allocation7 + $0x38] sm:$0xff]  }
 0x150   :  { %1450 = vmatpush3.bf16.msra.mxu1 %v1447_v40  ;;  %v1226_v57 = vpop.f32.mrb[19].mxu0 }
 0x151   :  { %1227 = vmatprep.subr.bf16.mxu1 %v1599_v49 }
 0x153   :  { %1196 = vmatmul.mubr.msk.f32.vlgmr.msra.gmra.mrb[0].mxu1 %vm288_vm3, %v1600_v60 }
 0x154   :  { %1198 = vmatprep.mubr.msk.f32.mxu1 %vm289_vm2, %v1600_v60  ;;  %1228 = vmatpush3.bf16.msra.mxu1 %v1712_v48 }
 0x155   :  { %1229 = vmatprep.subr.bf16.mxu1 %v1599_v49 }
 0x157   :  { %1199 = vmatmul.mubr.msk.f32.gmra.mrb[2].mxu1 %vm290_vm4, %v1600_v60 }
 0x158   :  { %1201 = vmatprep.mubr.msk.f32.mxu1 %vm291_vm5, %v1600_v60  ;;  %1230 = vmatpush3.bf16.msra.mxu1 %v1720_v50 }
 0x159   :  { %1231 = vmatprep.subr.bf16.mxu1 %v1599_v49 }
 0x15b   :  { %1202 = vmatmul.mubr.msk.f32.gmra.mrb[4].mxu1 %vm292_vm6, %v1600_v60 }
 0x15c   :  { %1204 = vmatprep.mubr.msk.f32.mxu1 %vm293_vm7, %v1600_v60  ;;  %1232 = vmatpush3.bf16.msra.mxu1 %v1727_v51 }
 0x15d   :  { %1233 = vmatprep.subr.bf16.mxu1 %v1599_v49 }
 0x15f   :  { %1205 = vmatmul.mubr.msk.f32.gmra.mrb[6].mxu1 %vm294_vm8, %v1600_v60 }
 0x160   :  { %1234 = vmatpush3.bf16.msra.mxu1 %v1734_v52  ;;  %1243 = vmatprep.mubr.msk.bf16.mxu1 %vm1601_vm1, %v1599_v49 }
 0x161   :  { %1235 = vmatprep.subr.bf16.mxu1 %v1599_v49 }
 0x164   :  { %1236 = vmatpush3.bf16.msra.mxu1 %v1741_v53 }
 0x165   :  { %1237 = vmatprep.subr.bf16.mxu1 %v1599_v49 }
 0x168   :  { %1238 = vmatpush3.bf16.msra.mxu1 %v1748_v54 }
 0x169   :  { %1239 = vmatprep.subr.bf16.mxu1 %v1599_v49 }
 0x16c   :  { %1240 = vmatpush3.bf16.msra.mxu1 %v1755_v56 }
 0x16d   :  { %1241 = vmatprep.subr.bf16.mxu1 %v1599_v49 }
 0x170   :  { %1242 = vmatpush3.bf16.msra.mxu1 %v1764_v58 }
 0x171   :  { %1267 = vmatprep.subr.bf16.mxu1 %v1599_v49 }
 0x226   :  { %v1197_v59 = vpop.f32.mrb[0].mxu1 }
 0x227   :  { %v369_v60 = vpop.f32.mrb[1].mxu1 }
 0x228   :  { %v512_v61 = vadd.f32 %v506_v46, %v369_v60  ;;  %v1479_v46 = vld [vmem:[#allocation7 + $0x30] sm:$0xff]  }
 0x22a   :  { %1481 = vtanh.f32 %v512_v61  ;;  %v1830_v62 = vpop.f32.mrb[2].mxu1 }
 0x22b   :  { %v379_v63 = vpop.f32.mrb[3].mxu1 }
 0x22e   :  { %v1832_v0 = vpop.f32.mrb[4].mxu1 }
 0x22f   :  { %v1834_v1 = vpop.f32.mrb[5].mxu1 }
 0x232   :  { %v1836_v2 = vpop.f32.mrb[6].mxu1 }
 0x233   :  { %v1838_v3 = vpop.f32.mrb[7].mxu1 }
 0x234   :  { %v1482_v4 = vpop.eup %1481 }
 0x235   :  { %v514_v5 = vpack.c.bf16 %v1482_v4, %v1482_v4 }
 0x237   :  { %1244 = vmatmul.mubr.bf16.vlgmr.msra.gmra.mrb[8].mxu1 %v514_v5 }
 0x238   :  { %1268 = vmatpush3.bf16.msra.mxu1 %v1712_v48  ;;  %1283 = vmatprep.mubr.msk.bf16.mxu1 %vm1601_vm1, %v1599_v49 }
 0x239   :  { %1269 = vmatprep.subr.bf16.mxu1 %v1599_v49 }
 0x23c   :  { %1270 = vmatpush3.bf16.msra.mxu1 %v1720_v50 }
 0x23d   :  { %1271 = vmatprep.subr.bf16.mxu1 %v1599_v49 }
 0x240   :  { %1272 = vmatpush3.bf16.msra.mxu1 %v1727_v51 }
 0x241   :  { %1273 = vmatprep.subr.bf16.mxu1 %v1599_v49 }
 0x244   :  { %1274 = vmatpush3.bf16.msra.mxu1 %v1734_v52 }
 0x245   :  { %1275 = vmatprep.subr.bf16.mxu1 %v1599_v49 }
 0x248   :  { %1276 = vmatpush3.bf16.msra.mxu1 %v1741_v53 }
 0x249   :  { %1277 = vmatprep.subr.bf16.mxu1 %v1599_v49 }
 0x24c   :  { %1278 = vmatpush3.bf16.msra.mxu1 %v1748_v54 }
 0x24d   :  { %1279 = vmatprep.subr.bf16.mxu1 %v1599_v49 }
 0x250   :  { %1280 = vmatpush3.bf16.msra.mxu1 %v1755_v56 }
 0x251   :  { %1281 = vmatprep.subr.bf16.mxu1 %v1599_v49 }
 0x254   :  { %1282 = vmatpush3.bf16.msra.mxu1 %v1764_v58 }
 0x255   :  { %1307 = vmatprep.subr.bf16.mxu1 %v1599_v49 }
 0x30a   :  { %v549_v6 = vpop.f32.mrb[8].mxu1 }
 0x30b   :  { %v555_v7 = vadd.f32 %v1197_v59, %v549_v6  ;;  %v1245_v8 = vpop.f32.mrb[9].mxu1 }
 0x30c   :  { %v552_v9 = vpop.f32.mrb[10].mxu1 }
 0x30d   :  { %1483 = vtanh.f32 %v555_v7  ;;  %v1246_v10 = vpop.f32.mrb[11].mxu1 }
 0x317   :  { %v1484_v11 = vpop.eup %1483 }
 0x318   :  { %v557_v12 = vpack.c.bf16 %v1484_v11, %v1484_v11 }
 0x31a   :  { %1264 = vmatmul.mubr.bf16.vlgmr.msra.gmra.mrb[20].mxu0 %v557_v12 }
 0x31b   :  { %1288 = vmatpush3.bf16.msra.mxu0 %v1712_v48  ;;  %1303 = vmatprep.mubr.msk.bf16.mxu0 %vm1601_vm1, %v1599_v49 }
 0x31c   :  { %1289 = vmatprep.subr.bf16.mxu0 %v1599_v49 }
 0x31f   :  { %1290 = vmatpush3.bf16.msra.mxu0 %v1720_v50 }
 0x320   :  { %1291 = vmatprep.subr.bf16.mxu0 %v1599_v49 }
 0x323   :  { %1292 = vmatpush3.bf16.msra.mxu0 %v1727_v51 }
 0x324   :  { %1293 = vmatprep.subr.bf16.mxu0 %v1599_v49 }
 0x327   :  { %1294 = vmatpush3.bf16.msra.mxu0 %v1734_v52 }
 0x328   :  { %1295 = vmatprep.subr.bf16.mxu0 %v1599_v49 }
 0x32b   :  { %1296 = vmatpush3.bf16.msra.mxu0 %v1741_v53 }
 0x32c   :  { %1297 = vmatprep.subr.bf16.mxu0 %v1599_v49 }
 0x32f   :  { %1298 = vmatpush3.bf16.msra.mxu0 %v1748_v54 }
 0x330   :  { %1299 = vmatprep.subr.bf16.mxu0 %v1599_v49 }
 0x333   :  { %1300 = vmatpush3.bf16.msra.mxu0 %v1755_v56 }
 0x334   :  { %1301 = vmatprep.subr.bf16.mxu0 %v1599_v49 }
 0x337   :  { %1302 = vmatpush3.bf16.msra.mxu0 %v1764_v58 }
 0x338   :  { %1327 = vmatprep.subr.bf16.mxu0 %v1599_v49 }
 0x3ed   :  { %v592_v13 = vpop.f32.mrb[20].mxu0 }
 0x3ee   :  { %v598_v14 = vadd.f32 %v592_v13, %v379_v63  ;;  %v1265_v15 = vpop.f32.mrb[21].mxu0 }
 0x3ef   :  { %v595_v16 = vpop.f32.mrb[22].mxu0 }
 0x3f0   :  { %1485 = vtanh.f32 %v598_v14  ;;  %v1266_v17 = vpop.f32.mrb[23].mxu0 }
 0x3fa   :  { %v1486_v18 = vpop.eup %1485 }
 0x3fb   :  { %v600_v19 = vpack.c.bf16 %v1486_v18, %v1486_v18 }
 0x3fd   :  { %1284 = vmatmul.mubr.bf16.vlgmr.msra.gmra.mrb[12].mxu1 %v600_v19 }
 0x3fe   :  { %1308 = vmatpush3.bf16.msra.mxu1 %v1712_v48  ;;  %1323 = vmatprep.mubr.msk.bf16.mxu1 %vm1601_vm1, %v1599_v49 }
 0x3ff   :  { %1309 = vmatprep.subr.bf16.mxu1 %v1599_v49 }
 0x402   :  { %1310 = vmatpush3.bf16.msra.mxu1 %v1720_v50 }
 0x403   :  { %1311 = vmatprep.subr.bf16.mxu1 %v1599_v49 }
 0x406   :  { %1312 = vmatpush3.bf16.msra.mxu1 %v1727_v51 }
 0x407   :  { %1313 = vmatprep.subr.bf16.mxu1 %v1599_v49 }
 0x40a   :  { %1314 = vmatpush3.bf16.msra.mxu1 %v1734_v52 }
 0x40b   :  { %1315 = vmatprep.subr.bf16.mxu1 %v1599_v49 }
 0x40e   :  { %1316 = vmatpush3.bf16.msra.mxu1 %v1741_v53 }
 0x40f   :  { %1317 = vmatprep.subr.bf16.mxu1 %v1599_v49 }
 0x412   :  { %1318 = vmatpush3.bf16.msra.mxu1 %v1748_v54 }
 0x413   :  { %1319 = vmatprep.subr.bf16.mxu1 %v1599_v49 }
 0x416   :  { %1320 = vmatpush3.bf16.msra.mxu1 %v1755_v56 }
 0x417   :  { %1321 = vmatprep.subr.bf16.mxu1 %v1599_v49 }
 0x41a   :  { %1322 = vmatpush3.bf16.msra.mxu1 %v1764_v58 }
 0x41b   :  { %1347 = vmatprep.subr.bf16.mxu1 %v1599_v49 }
 0x4d0   :  { %v635_v20 = vpop.f32.mrb[12].mxu1 }
 0x4d1   :  { %v641_v21 = vadd.f32 %v1830_v62, %v635_v20  ;;  %v1285_v22 = vpop.f32.mrb[13].mxu1 }
 0x4d2   :  { %v638_v23 = vpop.f32.mrb[14].mxu1 }
 0x4d3   :  { %1487 = vtanh.f32 %v641_v21  ;;  %v1286_v24 = vpop.f32.mrb[15].mxu1 }
 0x4dd   :  { %v1488_v25 = vpop.eup %1487 }
 0x4de   :  { %v643_v26 = vpack.c.bf16 %v1488_v25, %v1488_v25 }
 0x4e0   :  { %1304 = vmatmul.mubr.bf16.vlgmr.msra.gmra.mrb[24].mxu0 %v643_v26 }
 0x4e1   :  { %1328 = vmatpush3.bf16.msra.mxu0 %v1712_v48  ;;  %1343 = vmatprep.mubr.msk.bf16.mxu0 %vm1601_vm1, %v1599_v49 }
 0x4e2   :  { %1329 = vmatprep.subr.bf16.mxu0 %v1599_v49 }
 0x4e5   :  { %1330 = vmatpush3.bf16.msra.mxu0 %v1720_v50 }
 0x4e6   :  { %1331 = vmatprep.subr.bf16.mxu0 %v1599_v49 }
 0x4e9   :  { %1332 = vmatpush3.bf16.msra.mxu0 %v1727_v51 }
 0x4ea   :  { %1333 = vmatprep.subr.bf16.mxu0 %v1599_v49 }
 0x4ed   :  { %1334 = vmatpush3.bf16.msra.mxu0 %v1734_v52 }
 0x4ee   :  { %1335 = vmatprep.subr.bf16.mxu0 %v1599_v49 }
 0x4f1   :  { %1336 = vmatpush3.bf16.msra.mxu0 %v1741_v53 }
 0x4f2   :  { %1337 = vmatprep.subr.bf16.mxu0 %v1599_v49 }
 0x4f5   :  { %1338 = vmatpush3.bf16.msra.mxu0 %v1748_v54 }
 0x4f6   :  { %1339 = vmatprep.subr.bf16.mxu0 %v1599_v49 }
 0x4f9   :  { %1340 = vmatpush3.bf16.msra.mxu0 %v1755_v56 }
 0x4fa   :  { %1341 = vmatprep.subr.bf16.mxu0 %v1599_v49 }
 0x4fd   :  { %1342 = vmatpush3.bf16.msra.mxu0 %v1764_v58 }
 0x4fe   :  { %1367 = vmatprep.subr.bf16.mxu0 %v1599_v49 }
 0x5b3   :  { %v678_v27 = vpop.f32.mrb[24].mxu0 }
 0x5b4   :  { %v684_v28 = vadd.f32 %v678_v27, %v1834_v1  ;;  %v1305_v29 = vpop.f32.mrb[25].mxu0 }
 0x5b5   :  { %v681_v30 = vpop.f32.mrb[26].mxu0 }
 0x5b6   :  { %1489 = vtanh.f32 %v684_v28  ;;  %v1306_v31 = vpop.f32.mrb[27].mxu0 }
 0x5c0   :  { %v1490_v32 = vpop.eup %1489 }
 0x5c1   :  { %v686_v33 = vpack.c.bf16 %v1490_v32, %v1490_v32 }
 0x5c3   :  { %1324 = vmatmul.mubr.bf16.vlgmr.msra.gmra.mrb[16].mxu1 %v686_v33 }
 0x5c4   :  { %1348 = vmatpush3.bf16.msra.mxu1 %v1712_v48  ;;  %1363 = vmatprep.mubr.msk.bf16.mxu1 %vm1601_vm1, %v1599_v49 }
 0x5c5   :  { %1349 = vmatprep.subr.bf16.mxu1 %v1599_v49 }
 0x5c8   :  { %1350 = vmatpush3.bf16.msra.mxu1 %v1720_v50 }
 0x5c9   :  { %1351 = vmatprep.subr.bf16.mxu1 %v1599_v49 }
 0x5cc   :  { %1352 = vmatpush3.bf16.msra.mxu1 %v1727_v51 }
 0x5cd   :  { %1353 = vmatprep.subr.bf16.mxu1 %v1599_v49 }
 0x5d0   :  { %1354 = vmatpush3.bf16.msra.mxu1 %v1734_v52 }
 0x5d1   :  { %1355 = vmatprep.subr.bf16.mxu1 %v1599_v49 }
 0x5d4   :  { %1356 = vmatpush3.bf16.msra.mxu1 %v1741_v53 }
 0x5d5   :  { %1357 = vmatprep.subr.bf16.mxu1 %v1599_v49 }
 0x5d8   :  { %1358 = vmatpush3.bf16.msra.mxu1 %v1748_v54  ;;  %v1473_v54 = vld [vmem:[#allocation7] sm:$0xff]  }
 0x5d9   :  { %1359 = vmatprep.subr.bf16.mxu1 %v1599_v49 }
 0x5dc   :  { %1360 = vmatpush3.bf16.msra.mxu1 %v1755_v56  ;;  %v1474_v56 = vld [vmem:[#allocation7 + $0x8] sm:$0xff]  }
 0x5dd   :  { %1361 = vmatprep.subr.bf16.mxu1 %v1599_v49 }
 0x5e0   :  { %1362 = vmatpush3.bf16.msra.mxu1 %v1764_v58  ;;  %v1475_v58 = vld [vmem:[#allocation7 + $0x10] sm:$0xff]  }
 0x696   :  { %v721_v48 = vpop.f32.mrb[16].mxu1 }
 0x697   :  { %v727_v50 = vadd.f32 %v1832_v0, %v721_v48  ;;  %v1325_v51 = vpop.f32.mrb[17].mxu1  ;;  %v961_v0 = vld [vmem:[%s1964_s6] ss:$0 sm:$0xff] }
 0x698   :  { %v724_v52 = vpop.f32.mrb[18].mxu1 }
 0x699   :  { %1491 = vtanh.f32 %v727_v50  ;;  %v1326_v34 = vpop.f32.mrb[19].mxu1 }
 0x6a3   :  { %v1492_v53 = vpop.eup %1491 }
 0x6a4   :  { %v729_v35 = vpack.c.bf16 %v1492_v53, %v1492_v53 }
 0x6a6   :  { %1344 = vmatmul.mubr.bf16.vlgmr.msra.gmra.mrb[28].mxu0 %v729_v35 }
 0x6a7   :  { %1383 = vmatprep.mubr.msk.bf16.mxu0 %vm1601_vm1, %v1599_v49  ;;  %1368 = vmatpush3.bf16.msra.mxu0 %v1473_v54 }
 0x6a8   :  { %1369 = vmatprep.subr.bf16.mxu0 %v1599_v49 }
 0x6ab   :  { %1370 = vmatpush3.bf16.msra.mxu0 %v1474_v56 }
 0x6ac   :  { %1371 = vmatprep.subr.bf16.mxu0 %v1599_v49 }
 0x6af   :  { %1372 = vmatpush3.bf16.msra.mxu0 %v1475_v58 }
 0x6b0   :  { %1373 = vmatprep.subr.bf16.mxu0 %v1599_v49 }
 0x6b3   :  { %1374 = vmatpush3.bf16.msra.mxu0 %v1476_v36 }
 0x6b4   :  { %1375 = vmatprep.subr.bf16.mxu0 %v1599_v49 }
 0x6b7   :  { %1376 = vmatpush3.bf16.msra.mxu0 %v1477_v44 }
 0x6b8   :  { %1377 = vmatprep.subr.bf16.mxu0 %v1599_v49 }
 0x6bb   :  { %1378 = vmatpush3.bf16.msra.mxu0 %v1478_v45 }
 0x6bc   :  { %1379 = vmatprep.subr.bf16.mxu0 %v1599_v49 }
 0x6bf   :  { %1380 = vmatpush3.bf16.msra.mxu0 %v1479_v46 }
 0x6c0   :  { %1381 = vmatprep.subr.bf16.mxu0 %v1599_v49 }
 0x6c3   :  { %1382 = vmatpush3.bf16.msra.mxu0 %v1480_v47 }
 0x779   :  { %v764_v37 = vpop.f32.mrb[28].mxu0 }
 0x77a   :  { %v770_v38 = vadd.f32 %v764_v37, %v1838_v3  ;;  %v1345_v39 = vpop.f32.mrb[29].mxu0 }
 0x77b   :  { %v767_v40 = vpop.f32.mrb[30].mxu0 }
 0x77c   :  { %1493 = vtanh.f32 %v770_v38  ;;  %v1346_v41 = vpop.f32.mrb[31].mxu0 }
 0x786   :  { %v1494_v42 = vpop.eup %1493 }
 0x787   :  { %v772_v43 = vpack.c.bf16 %v1494_v42, %v1494_v42 }
 0x789   :  { %1364 = vmatmul.mubr.bf16.vlgmr.msra.gmra.mrb[20].mxu1 %v772_v43 }
 0x85c   :  { %v807_v55 = vpop.f32.mrb[20].mxu1 }
 0x85d   :  { %v813_v57 = vadd.f32 %v1836_v2, %v807_v55  ;;  %v1365_v59 = vpop.f32.mrb[21].mxu1 }
 0x85e   :  { %v810_v60 = vpop.f32.mrb[22].mxu1 }
 0x85f   :  { %1495 = vtanh.f32 %v813_v57  ;;  %v1366_v61 = vpop.f32.mrb[23].mxu1 }
 0x869   :  { %v1496_v62 = vpop.eup %1495 }
 0x86a   :  { %v815_v63 = vpack.c.bf16 %v1496_v62, %v1496_v62 }
 0x86c   :  { %1384 = vmatmul.mubr.bf16.vlgmr.msra.gmra.mrb[32].mxu0 %v815_v63 }
 0x93f   :  { %v921_v1 = vpop.f32.mrb[32].mxu0 }
 0x940   :  { %v922_v49 = vadd.f32 %v961_v0, %v921_v1  ;;  %v1385_v3 = vpop.f32.mrb[33].mxu0 }
 0x941   :  { %v924_v4 = vpop.f32.mrb[34].mxu0 }
 0x942   :  { %927 = vst [vmem:[#allocation8] sm:$0xff] %v922_v49  ;;  %v1386_v2 = vpop.f32.mrb[35].mxu0 }
 0x943   :  { %1574 = shalt.err (!%p1571_p0)
}
 0x944   :  { %s1575_s6 = scalar_lea.hbm %s1965_s7, 128 }
 0x945   :  { %p1576_p1 = scmp.ne.s32.totalorder %s1965_s7, %s1575_s6  ;;  %p1579_p2 = scmp.lt.u32.totalorder %s1575_s6, %s1965_s7 }
 0x947   :  { %p1581_p3 = pnand %p1579_p2, %p1576_p1 }
 0x949   :  { %1584 = shalt.err (!%p1581_p3)
}
 0x94a   :  { %937 = dma.vmem_to_hbm [thread:$0]  %s935_s23, 128, %s1965_s7, [#allocation4]  }
 0x94b   :  { %1589 = dma.done.wait [#allocation4], 128  }
 0x94c   :  { %1590 = vsyncadd [#allocation4], 4294967168 }
 0x94d   :  { %941 = vsyncpa [#allocation3], 1 }
 0x94e   :  { %942 = vsyncpa [#allocation6], 1 }
 0x94f   :  { %943 = vsyncpa [#allocation4], 1 }

</bundles_post_ra>
